<compile_context>
chip_gen: v7x
topology: tpu7x:2x2x1
jax: 0.10.0
libtpu: 0.0.40
codegen_flags: <defaults>
</compile_context>

<pallas_src>
import functools

import jax
import jax.numpy as jnp
from jax.experimental import pallas as pl
from jax.experimental.pallas import tpu as pltpu


def _project3d_kernel(p_ref, pts_ref, out_ref, *, eps):
    # p_ref   : SMEM (12,) f32  -- normalization-folded projection matrix, row-major
    # pts_ref : VMEM (d_blk, 4, hw_blk) points block
    # out_ref : VMEM (d_blk, 2, hw_blk) normalized (x, y) planes (channels-first)
    px = pts_ref[:, 0, :]                  # (d_blk, hw_blk) per-component reads
    py = pts_ref[:, 1, :]
    pz = pts_ref[:, 2, :]
    pw = pts_ref[:, 3, :]

    # cam = P_norm @ [x; y; z; w] as scalar-broadcast FMAs (VPU only, no MXU).
    cam_x = p_ref[0] * px + p_ref[1] * py + p_ref[2] * pz + p_ref[3] * pw
    cam_y = p_ref[4] * px + p_ref[5] * py + p_ref[6] * pz + p_ref[7] * pw
    cam_z = p_ref[8] * px + p_ref[9] * py + p_ref[10] * pz + p_ref[11] * pw

    # Exact divide (matches the reference for near-zero / degenerate depths;
    # the kernel is HBM-bound so the extra cost vs approx reciprocal is free).
    inv = 1.0 / (cam_z + eps)

    out_ref[:, 0, :] = cam_x * inv - 1.0
    out_ref[:, 1, :] = cam_y * inv - 1.0


def _tpu_budget():
    """(small_vmem, vmem_limit_bytes) -- generation-aware, with a safe fallback."""
    vmem_cap = 64 * 1024 * 1024            # conservative default (v7x-sized)
    try:
        info = pltpu.get_tpu_info()
        for attr in ("vmem_capacity_bytes", "vmem_size_bytes", "vmem_bytes"):
            cap = getattr(info, attr, None)
            if cap:
                vmem_cap = int(cap)
                break
    except Exception:
        pass
    small = vmem_cap <= 80 * 1024 * 1024
    limit = (48 if small else 80) * 1024 * 1024
    return small, limit


def _choose_blocks(D, hw, *, small_vmem):
    """Pick (d_blk, hw_blk).

    Legality: d_blk is a multiple of 8 or equals D; hw_blk is a multiple of
    128 or equals hw (ragged last blocks are masked by Pallas).
    Sizing: per-step working set ~12 MiB on 64-MiB-VMEM parts, ~20 MiB on
    128-MiB parts, counting the 4->8 / 2->8 sublane padding of the blocks.
    """
    lane_cap = 32768 if small_vmem else 65536
    target = (12 if small_vmem else 20) * 1024 * 1024

    d_blk = D if D <= 8 else 8
    per_lane = d_blk * (8 + 8) * 4         # padded input + output bytes per lane
    hw_budget = max(512, (target // per_lane) // 128 * 128)
    cap = min(lane_cap, hw_budget)
    hw_blk = hw if hw <= cap else cap      # full dim, or a multiple of 128

    # If the whole lane axis fits, spend the remaining budget on more depth
    # rows per step instead (amortizes the ~0.35 us/step overhead).
    if hw_blk == hw and D > 8:
        per_d = (8 + 8) * 4 * hw_blk
        d_cap = max(8, int(target // per_d) // 8 * 8)
        d_blk = D if d_cap >= D else d_cap

    return d_blk, hw_blk


def project3d(points, K, E, *, height, width, eps=1e-6, channels_last=True):
    """Pallas implementation of Project3D.forward.

    points : [D, 4, H*W] float32
    K, E   : [1, 4, 4]   float32
    returns: [D, H, W, 2] float32 normalized to [-1, 1] (channels_last=True),
             or [D, 2, H, W] with zero extra HBM passes (channels_last=False).
    """
    D, four, hw = points.shape
    assert four == 4 and hw == height * width

    pts = points.astype(jnp.float32)
    K2 = K.reshape(4, 4).astype(jnp.float32)
    E2 = E.reshape(4, 4).astype(jnp.float32)

    # Hoisted out of the kernel: camera composition + folded normalization.
    #   out_x = (2/(W-1)) * cam_x / (cam_z + eps) - 1   (same for y with H)
    P = jnp.matmul(K2, E2, precision=jax.lax.Precision.HIGHEST)[:3, :]   # (3, 4)
    scale = jnp.array([2.0 / (width - 1), 2.0 / (height - 1), 1.0],
                      dtype=jnp.float32)[:, None]
    p_flat = (P * scale).reshape(12)                                     # SMEM scalars

    small_vmem, vmem_limit = _tpu_budget()
    d_blk, hw_blk = _choose_blocks(D, hw, small_vmem=small_vmem)
    grid = (pl.cdiv(D, d_blk), pl.cdiv(hw, hw_blk))

    kernel = functools.partial(_project3d_kernel, eps=float(eps))

    out = pl.pallas_call(
        kernel,
        out_shape=jax.ShapeDtypeStruct((D, 2, hw), jnp.float32),
        grid=grid,
        in_specs=[
            pl.BlockSpec(memory_space=pltpu.MemorySpace.SMEM),           # P_norm (12,)
            pl.BlockSpec((d_blk, 4, hw_blk), lambda i, j: (i, 0, j)),    # points block
        ],
        out_specs=pl.BlockSpec((d_blk, 2, hw_blk), lambda i, j: (i, 0, j)),
        compiler_params=pltpu.CompilerParams(
            dimension_semantics=("parallel", "parallel"),
            vmem_limit_bytes=vmem_limit,
        ),
        cost_estimate=pl.CostEstimate(
            flops=30 * D * hw,
            transcendentals=D * hw,
            bytes_accessed=24 * D * hw,
        ),
    )(p_flat, pts)

    out = out.reshape(D, 2, height, width)
    if not channels_last:
        return out                                   # [D, 2, H, W], no extra pass
    # TODO(synk): per-pixel channels-last interleave done as one fused XLA
    # transpose; an in-kernel f32 lane shuffle has no safe Mosaic lowering.
    return out.transpose(0, 2, 3, 1)                 # [D, H, W, 2]


def _project3d_reference(points, K, E, *, height, width, eps=1e-6):
    """Plain-JAX reference mirroring the PyTorch forward exactly."""
    D = points.shape[0]
    P = jnp.matmul(K, E, precision=jax.lax.Precision.HIGHEST)[:, :3, :]   # [1, 3, 4]
    cam = jnp.matmul(P, points, precision=jax.lax.Precision.HIGHEST)      # [D, 3, H*W]
    pix = cam[:, :2, :] / (cam[:, 2:3, :] + eps)                          # [D, 2, H*W]
    pix = pix.reshape(D, 2, height, width).transpose(0, 2, 3, 1)
    pix = pix.at[..., 0].divide(width - 1)
    pix = pix.at[..., 1].divide(height - 1)
    return (pix - 0.5) * 2.0


def _run_case(D, H, W, key):
    kp, ke = jax.random.split(key, 2)
    points = jax.random.normal(kp, (D, 4, H * W), dtype=jnp.float32)
    points = points.at[:, 3, :].set(1.0)              # well-behaved homogeneous coord

    # Deterministic, plausible camera matrices (no checkpoint load).
    K_intr = jnp.array([[W / 2.0, 0.0, W / 2.0, 0.0],
                        [0.0, H / 2.0, H / 2.0, 0.0],
                        [0.0, 0.0, 1.0, 0.0],
                        [0.0, 0.0, 0.0, 1.0]], dtype=jnp.float32)[None]
    E_extr = jnp.eye(4, dtype=jnp.float32)[None]
    E_extr = E_extr + 0.01 * jax.random.normal(ke, (1, 4, 4), dtype=jnp.float32)
    E_extr = E_extr.at[0, 2, 3].set(5.0)               # keep points in front of camera

    out = project3d(points, K_intr, E_extr, height=H, width=W)
    out = jax.block_until_ready(out)

    ref = _project3d_reference(points, K_intr, E_extr, height=H, width=W)
    assert out.shape == (D, H, W, 2)
    max_err = float(jnp.max(jnp.abs(out - ref)))
    assert jnp.allclose(out, ref, rtol=1e-4, atol=1e-4), max_err


if __name__ == "__main__":
    root = jax.random.PRNGKey(0)
    # Primary small case: D = num_depth_bins = 16, H = W = 16.
    _run_case(16, 16, 16, jax.random.fold_in(root, 0))
    # Secondary case: D < 8 and H*W not a multiple of 128 (full-dim blocks).
    _run_case(5, 12, 20, jax.random.fold_in(root, 1))
    print("KERNEL_OK")
</pallas_src>

<mosaic_0001>
module attributes {stable_mosaic.version = 11 : i64} {
  func.func @_project3d_kernel(%arg0: i32, %arg1: i32, %arg2: memref<12xf32, #tpu.memory_space<smem>>, %arg3: memref<16x4x256xf32, #tpu.memory_space<vmem>>, %arg4: memref<16x2x256xf32, #tpu.memory_space<vmem>>) attributes {dimension_semantics = [#tpu.dimension_semantics<parallel>, #tpu.dimension_semantics<parallel>], iteration_bounds = array<i64: 1, 1>, scalar_prefetch = 0 : i64, scratch_operands = 0 : i64, tpu.core_type = #tpu.core_type<tc>, window_params = [{transform_indices = @transform_0, window_bounds = array<i64: 12>}, {transform_indices = @transform_1, window_bounds = array<i64: 16, 4, 256>}, {transform_indices = @transform_2, window_bounds = array<i64: 16, 2, 256>}]} {
    %c0 = arith.constant 0 : index
    %c0_0 = arith.constant 0 : index
    %c0_1 = arith.constant 0 : index
    %0 = vector.load %arg3[%c0, %c0_0, %c0_1] : memref<16x4x256xf32, #tpu.memory_space<vmem>>, vector<16x1x256xf32>
    %1 = vector.shape_cast %0 : vector<16x1x256xf32> to vector<16x256xf32>
    %c0_2 = arith.constant 0 : index
    %c1 = arith.constant 1 : index
    %c0_3 = arith.constant 0 : index
    %2 = vector.load %arg3[%c0_2, %c1, %c0_3] : memref<16x4x256xf32, #tpu.memory_space<vmem>>, vector<16x1x256xf32>
    %3 = vector.shape_cast %2 : vector<16x1x256xf32> to vector<16x256xf32>
    %c0_4 = arith.constant 0 : index
    %c2 = arith.constant 2 : index
    %c0_5 = arith.constant 0 : index
    %4 = vector.load %arg3[%c0_4, %c2, %c0_5] : memref<16x4x256xf32, #tpu.memory_space<vmem>>, vector<16x1x256xf32>
    %5 = vector.shape_cast %4 : vector<16x1x256xf32> to vector<16x256xf32>
    %c0_6 = arith.constant 0 : index
    %c3 = arith.constant 3 : index
    %c0_7 = arith.constant 0 : index
    %6 = vector.load %arg3[%c0_6, %c3, %c0_7] : memref<16x4x256xf32, #tpu.memory_space<vmem>>, vector<16x1x256xf32>
    %7 = vector.shape_cast %6 : vector<16x1x256xf32> to vector<16x256xf32>
    %c0_8 = arith.constant 0 : index
    %8 = memref.load %arg2[%c0_8] : memref<12xf32, #tpu.memory_space<smem>>
    %9 = vector.broadcast %8 : f32 to vector<16x256xf32>
    %10 = arith.mulf %9, %1 : vector<16x256xf32>
    %c1_9 = arith.constant 1 : index
    %11 = memref.load %arg2[%c1_9] : memref<12xf32, #tpu.memory_space<smem>>
    %12 = vector.broadcast %11 : f32 to vector<16x256xf32>
    %13 = arith.mulf %12, %3 : vector<16x256xf32>
    %14 = arith.addf %10, %13 : vector<16x256xf32>
    %c2_10 = arith.constant 2 : index
    %15 = memref.load %arg2[%c2_10] : memref<12xf32, #tpu.memory_space<smem>>
    %16 = vector.broadcast %15 : f32 to vector<16x256xf32>
    %17 = arith.mulf %16, %5 : vector<16x256xf32>
    %18 = arith.addf %14, %17 : vector<16x256xf32>
    %c3_11 = arith.constant 3 : index
    %19 = memref.load %arg2[%c3_11] : memref<12xf32, #tpu.memory_space<smem>>
    %20 = vector.broadcast %19 : f32 to vector<16x256xf32>
    %21 = arith.mulf %20, %7 : vector<16x256xf32>
    %22 = arith.addf %18, %21 : vector<16x256xf32>
    %c4 = arith.constant 4 : index
    %23 = memref.load %arg2[%c4] : memref<12xf32, #tpu.memory_space<smem>>
    %24 = vector.broadcast %23 : f32 to vector<16x256xf32>
    %25 = arith.mulf %24, %1 : vector<16x256xf32>
    %c5 = arith.constant 5 : index
    %26 = memref.load %arg2[%c5] : memref<12xf32, #tpu.memory_space<smem>>
    %27 = vector.broadcast %26 : f32 to vector<16x256xf32>
    %28 = arith.mulf %27, %3 : vector<16x256xf32>
    %29 = arith.addf %25, %28 : vector<16x256xf32>
    %c6 = arith.constant 6 : index
    %30 = memref.load %arg2[%c6] : memref<12xf32, #tpu.memory_space<smem>>
    %31 = vector.broadcast %30 : f32 to vector<16x256xf32>
    %32 = arith.mulf %31, %5 : vector<16x256xf32>
    %33 = arith.addf %29, %32 : vector<16x256xf32>
    %c7 = arith.constant 7 : index
    %34 = memref.load %arg2[%c7] : memref<12xf32, #tpu.memory_space<smem>>
    %35 = vector.broadcast %34 : f32 to vector<16x256xf32>
    %36 = arith.mulf %35, %7 : vector<16x256xf32>
    %37 = arith.addf %33, %36 : vector<16x256xf32>
    %c8 = arith.constant 8 : index
    %38 = memref.load %arg2[%c8] : memref<12xf32, #tpu.memory_space<smem>>
    %39 = vector.broadcast %38 : f32 to vector<16x256xf32>
    %40 = arith.mulf %39, %1 : vector<16x256xf32>
    %c9 = arith.constant 9 : index
    %41 = memref.load %arg2[%c9] : memref<12xf32, #tpu.memory_space<smem>>
    %42 = vector.broadcast %41 : f32 to vector<16x256xf32>
    %43 = arith.mulf %42, %3 : vector<16x256xf32>
    %44 = arith.addf %40, %43 : vector<16x256xf32>
    %c10 = arith.constant 10 : index
    %45 = memref.load %arg2[%c10] : memref<12xf32, #tpu.memory_space<smem>>
    %46 = vector.broadcast %45 : f32 to vector<16x256xf32>
    %47 = arith.mulf %46, %5 : vector<16x256xf32>
    %48 = arith.addf %44, %47 : vector<16x256xf32>
    %c11 = arith.constant 11 : index
    %49 = memref.load %arg2[%c11] : memref<12xf32, #tpu.memory_space<smem>>
    %50 = vector.broadcast %49 : f32 to vector<16x256xf32>
    %51 = arith.mulf %50, %7 : vector<16x256xf32>
    %52 = arith.addf %48, %51 : vector<16x256xf32>
    %cst = arith.constant 9.99999997E-7 : f32
    %53 = vector.broadcast %cst : f32 to vector<16x256xf32>
    %54 = arith.addf %52, %53 : vector<16x256xf32>
    %cst_12 = arith.constant 1.000000e+00 : f32
    %55 = vector.broadcast %cst_12 : f32 to vector<16x256xf32>
    %56 = arith.divf %55, %54 : vector<16x256xf32>
    %57 = arith.mulf %22, %56 : vector<16x256xf32>
    %cst_13 = arith.constant 1.000000e+00 : f32
    %58 = vector.broadcast %cst_13 : f32 to vector<16x256xf32>
    %59 = arith.subf %57, %58 : vector<16x256xf32>
    %c0_14 = arith.constant 0 : index
    %c0_15 = arith.constant 0 : index
    %c0_16 = arith.constant 0 : index
    %60 = vector.load %arg4[%c0_14, %c0_15, %c0_16] : memref<16x2x256xf32, #tpu.memory_space<vmem>>, vector<16x1x256xf32>
    %61 = vector.shape_cast %60 : vector<16x1x256xf32> to vector<16x256xf32>
    %62 = vector.shape_cast %59 : vector<16x256xf32> to vector<16x1x256xf32>
    tpu.vector_store %arg4[%c0_14, %c0_15, %c0_16], %62 {strides = array<i32>} : memref<16x2x256xf32, #tpu.memory_space<vmem>>, vector<16x1x256xf32>,
    %63 = arith.mulf %37, %56 : vector<16x256xf32>
    %cst_17 = arith.constant 1.000000e+00 : f32
    %64 = vector.broadcast %cst_17 : f32 to vector<16x256xf32>
    %65 = arith.subf %63, %64 : vector<16x256xf32>
    %c0_18 = arith.constant 0 : index
    %c1_19 = arith.constant 1 : index
    %c0_20 = arith.constant 0 : index
    %66 = vector.load %arg4[%c0_18, %c1_19, %c0_20] : memref<16x2x256xf32, #tpu.memory_space<vmem>>, vector<16x1x256xf32>
    %67 = vector.shape_cast %66 : vector<16x1x256xf32> to vector<16x256xf32>
    %68 = vector.shape_cast %65 : vector<16x256xf32> to vector<16x1x256xf32>
    tpu.vector_store %arg4[%c0_18, %c1_19, %c0_20], %68 {strides = array<i32>} : memref<16x2x256xf32, #tpu.memory_space<vmem>>, vector<16x1x256xf32>,
    return
  }
  func.func @transform_0(%arg0: i32, %arg1: i32) -> i32 {
    %c0_i32 = arith.constant 0 : i32
    %c0_i32_0 = arith.constant 0 : i32
    return %c0_i32 : i32
  }
  func.func @transform_1(%arg0: i32, %arg1: i32) -> (i32, i32, i32) {
    %c0_i32 = arith.constant 0 : i32
    %c0_i32_0 = arith.constant 0 : i32
    return %arg0, %c0_i32, %arg1 : i32, i32, i32
  }
  func.func @transform_2(%arg0: i32, %arg1: i32) -> (i32, i32, i32) {
    %c0_i32 = arith.constant 0 : i32
    %c0_i32_0 = arith.constant 0 : i32
    return %arg0, %c0_i32, %arg1 : i32, i32, i32
  }
}

</mosaic_0001>

<bundles_post_ra>
// kernel: tpu_custom_call.1
= control target key start
LH: loop header
LB: loop body
LE: loop exit
PB: predicated region body
PF: predicated region fallthrough
CT: control target
= control target key end

     0   :  { %7 = vsyncpa [#allocation5], 0  ;;  %s1650_s0 = inlined_call_operand.hbm [shape: f32[12], index: 0, kind: input, shape index: {}]   ;;  %s1651_s1 = inlined_call_operand.hbm [shape: f32[16,4,256], index: 1, kind: input, shape index: {}]   ;;  %s1652_s2 = inlined_call_operand.hbm [shape: f32[16,2,256], index: 2, kind: output, shape index: {}]  }
   0x1   :  { %8 = vsyncpa [#allocation3], 0 }
   0x2   :  { %9 = vsyncpa [#allocation4], 0  ;;  %s803_s11 = scalar_lea.hbm %s1650_s0, 16 }
   0x3   :  { %p804_p0 = scmp.ne.s32.totalorder %s1650_s0, %s803_s11  ;;  %p807_p1 = scmp.lt.u32.totalorder %s803_s11, %s1650_s0 }
   0x5   :  { %p809_p2 = pnand %p807_p1, %p804_p0 }
   0x7   :  { %812 = shalt.err (!%p809_p2)
}
   0x8   :  { %s863_s16 = smov [#allocation2]   ;;  %s864_s19 = smov [#allocation6]  }
   0x9   :  { %17 = dma.hbm_to_smem %s1650_s0, 16, %s863_s16, [#allocation5]  }
   0xa   :  { %s23_s20 = sshll.u32 %s864_s19, 4  ;;  %s813_s23 = scalar_lea.hbm %s1651_s1, 2048  ;;  %s24_s20 = int_to_ptr.vmem [resolvable:$true] %s23_s20 }
   0xb   :  { %p814_p3 = scmp.ne.s32.totalorder %s1651_s1, %s813_s23  ;;  %p817_p4 = scmp.lt.u32.totalorder %s813_s23, %s1651_s1 }
   0xd   :  { %p819_p5 = pnand %p817_p4, %p814_p3 }
   0xf   :  { %822 = shalt.err (!%p819_p5)
}
  0x10   :  { %s823_s28 = scalar_lea.vmem %s24_s20, 2048  ;;  %p828_p7 = scmp.lt.s32.totalorder %s24_s20, %s24_s20 }
  0x11   :  { %p824_p6 = scmp.ne.s32.totalorder %s24_s20, %s823_s28  ;;  %p829_p8 = scmp.lt.s32.totalorder %s823_s28, %s823_s28 }
  0x13   :  { %p830_p9 = por %p829_p8, %p828_p7 }
  0x15   :  { %p831_p10 = pnand %p830_p9, %p824_p6 }
  0x17   :  { %834 = shalt.err (!%p831_p10)
}
  0x18   :  { %s865_s0 = smov 128   ;;  %s866_s29 = smov 8  }
  0x19   :  { %29 = dma.hbm_to_vmem [thread:$0]  %s1651_s1, 2048, %s24_s20, [#allocation3], %s865_s0, %s865_s0, %s866_s29  }
  0x1a   :  { %857 = dma.done.wait [#allocation5], 16  }
  0x1b   :  { %858 = vsyncadd [#allocation5], 4294967280 }
  0x1c   :  { %859 = dma.done.wait [#allocation3], 2048  }
  0x1d   :  { %860 = vsyncadd [#allocation3], 4294965248 }
  0x1e   :  { %36 = sfence }
  0x1f   :  { %s164_s4 = sld [smem:[#allocation2]]  ;;  %s721_s5 = sld [smem:[#allocation2 + $0x1]]  ;;  %v909_v0 = vld [vmem:[#allocation6] ss:$4 sm:$0x3]  ;;  %v604_v4 = vlaneseq }
  0x20   :  { %s722_s6 = sld [smem:[#allocation2 + $0x2]]  ;;  %s723_s7 = sld [smem:[#allocation2 + $0x3]]  ;;  %v911_v1 = vld [vmem:[#allocation6 + $0x1] ss:$4 sm:$0x3] }
  0x21   :  { %s728_s8 = sld [smem:[#allocation2 + $0x8]]  ;;  %s729_s9 = sld [smem:[#allocation2 + $0x9]]  ;;  %v917_v5 = vld [vmem:[#allocation6 + $0x2] ss:$4 sm:$0x3]  ;;  %vm1040_vm0 = vcmp.lt.s32.totalorder %v604_v4, 256 }
  0x22   :  { %s730_s10 = sld [smem:[#allocation2 + $0xa]]  ;;  %s731_s11 = sld [smem:[#allocation2 + $0xb]]  ;;  %v919_v6 = vld [vmem:[#allocation6 + $0x3] ss:$4 sm:$0x3] }
  0x23   :  { %v943_v19 = vld [vmem:[#allocation6 + $0x8] ss:$4 sm:$0x3]  ;;  %v945_v20 = vld [vmem:[#allocation6 + $0x9] ss:$4 sm:$0x3] }
  0x24   :  { %v951_v23 = vld [vmem:[#allocation6 + $0xa] ss:$4 sm:$0x3]  ;;  %v953_v24 = vld [vmem:[#allocation6 + $0xb] ss:$4 sm:$0x3] }
  0x25   :  { %v913_v2 = vstv %s164_s4  ;;  %v915_v3 = vstv %s721_s5  ;;  %v969_v35 = vld [vmem:[#allocation6 + $0x10] ss:$4 sm:$0x3]  ;;  %v977_v40 = vld [vmem:[#allocation6 + $0x11] ss:$4 sm:$0x3] }
  0x26   :  { %v166_v7 = vmul.f32 %v913_v2, %v909_v0  ;;  %v184_v8 = vmul.f32 %v915_v3, %v911_v1  ;;  %v925_v9 = vstv %s722_s6  ;;  %v927_v10 = vstv %s723_s7  ;;  %v979_v43 = vld [vmem:[#allocation6 + $0x12] ss:$4 sm:$0x3]  ;;  %v981_v44 = vld [vmem:[#allocation6 + $0x13] ss:$4 sm:$0x3] }
  0x27   :  { %v218_v11 = vmul.f32 %v925_v9, %v917_v5  ;;  %v252_v12 = vmul.f32 %v927_v10, %v919_v6  ;;  %v933_v13 = vstv %s728_s8  ;;  %v935_v14 = vstv %s729_s9  ;;  %v997_v55 = vld [vmem:[#allocation6 + $0x18] ss:$4 sm:$0x3]  ;;  %v1003_v59 = vld [vmem:[#allocation6 + $0x19] ss:$4 sm:$0x3] }
  0x28   :  { %v200_v15 = vadd.f32 %v184_v8, %v166_v7  ;;  %v406_v16 = vmul.f32 %v933_v13, %v909_v0  ;;  %v424_v17 = vmul.f32 %v935_v14, %v911_v1  ;;  %v941_v18 = vstv %s730_s10  ;;  %v1007_v7 = vld [vmem:[#allocation6 + $0x1a] ss:$4 sm:$0x3]  ;;  %v1009_v8 = vld [vmem:[#allocation6 + $0x1b] ss:$4 sm:$0x3] }
  0x29   :  { %v458_v21 = vmul.f32 %v941_v18, %v917_v5  ;;  %v949_v22 = vstv %s731_s11  ;;  %v167_v25 = vmul.f32 %v913_v2, %v943_v19  ;;  %v185_v26 = vmul.f32 %v915_v3, %v945_v20  ;;  %s1364_s1 = sld [smem:[#allocation2 + $0x4]]  ;;  %s1372_s12 = sld [smem:[#allocation2 + $0x5]] }
  0x2a   :  { %v234_v27 = vadd.f32 %v218_v11, %v200_v15  ;;  %v440_v28 = vadd.f32 %v424_v17, %v406_v16  ;;  %v492_v29 = vmul.f32 %v949_v22, %v919_v6  ;;  %v219_v30 = vmul.f32 %v925_v9, %v951_v23  ;;  %s1378_s13 = sld [smem:[#allocation2 + $0x6]]  ;;  %s1380_s14 = sld [smem:[#allocation2 + $0x7]] }
  0x2b   :  { %v201_v31 = vadd.f32 %v185_v26, %v167_v25  ;;  %v253_v32 = vmul.f32 %v927_v10, %v953_v24  ;;  %v407_v33 = vmul.f32 %v933_v13, %v943_v19  ;;  %v425_v34 = vmul.f32 %v935_v14, %v945_v20  ;;  %s867_s15 = smov [#allocation7]  }
  0x2c   :  { %v971_v36 = vadd.f32 %v252_v12, %v234_v27  ;;  %v474_v37 = vadd.f32 %v458_v21, %v440_v28  ;;  %v459_v38 = vmul.f32 %v941_v18, %v951_v23  ;;  %v493_v39 = vmul.f32 %v949_v22, %v953_v24  ;;  %v1021_v27 = vld [vmem:[#allocation6 + $0x20] ss:$4 sm:$0x3]  ;;  %s708_s16 = sshll.u32 %s867_s15, 4  ;;  %s709_s16 = int_to_ptr.vmem [resolvable:$true] %s708_s16 }
  0x2d   :  { %v235_v41 = vadd.f32 %v219_v30, %v201_v31  ;;  %v441_v42 = vadd.f32 %v425_v34, %v407_v33  ;;  %v168_v45 = vmul.f32 %v913_v2, %v969_v35  ;;  %v186_v46 = vmul.f32 %v915_v3, %v977_v40  ;;  %v1029_v31 = vld [vmem:[#allocation6 + $0x21] ss:$4 sm:$0x3]  ;;  %s835_s17 = scalar_lea.vmem %s709_s16, 1024  ;;  %p840_p12 = scmp.lt.s32.totalorder %s709_s16, %s709_s16 }
  0x2e   :  { %v508_v47 = vadd.f32 %v492_v29, %v474_v37  ;;  %v220_v48 = vmul.f32 %v925_v9, %v979_v43  ;;  %v254_v49 = vmul.f32 %v927_v10, %v981_v44  ;;  %v408_v50 = vmul.f32 %v933_v13, %v969_v35  ;;  %v1033_v37 = vld [vmem:[#allocation6 + $0x22] ss:$4 sm:$0x3]  ;;  %p836_p11 = scmp.ne.s32.totalorder %s709_s16, %s835_s17  ;;  %p841_p13 = scmp.lt.s32.totalorder %s835_s17, %s835_s17 }
  0x2f   :  { %v993_v51 = vadd.f32 %v253_v32, %v235_v41  ;;  %v475_v52 = vadd.f32 %v459_v38, %v441_v42  ;;  %v202_v53 = vadd.f32 %v186_v46, %v168_v45  ;;  %v426_v54 = vmul.f32 %v935_v14, %v977_v40  ;;  %v1035_v38 = vld [vmem:[#allocation6 + $0x23] ss:$4 sm:$0x3] }
  0x30   :  { %v524_v56 = vadd.f32 1e-06, %v508_v47  ;;  %v460_v57 = vmul.f32 %v941_v18, %v979_v43  ;;  %v494_v58 = vmul.f32 %v949_v22, %v981_v44  ;;  %v169_v60 = vmul.f32 %v913_v2, %v997_v55  ;;  %p842_p0 = por %p841_p13, %p840_p12 }
  0x31   :  { %v509_v61 = vadd.f32 %v493_v39, %v475_v52  ;;  %v236_v62 = vadd.f32 %v220_v48, %v202_v53  ;;  %v442_v63 = vadd.f32 %v426_v54, %v408_v50  ;;  %v187_v11 = vmul.f32 %v915_v3, %v1003_v59  ;;  %v1054_v52 = vld [vmem:[#allocation6 + $0x28] ss:$4 sm:$0x3] }
  0x32   :  { %771 = vrcp.f32 %v524_v56  ;;  %v221_v12 = vmul.f32 %v925_v9, %v1007_v7  ;;  %v255_v15 = vmul.f32 %v927_v10, %v1009_v8  ;;  %v409_v16 = vmul.f32 %v933_v13, %v997_v55  ;;  %p843_p1 = pnand %p842_p0, %p836_p11 }
  0x33   :  { %v525_v17 = vadd.f32 1e-06, %v509_v61  ;;  %v1019_v21 = vadd.f32 %v254_v49, %v236_v62  ;;  %v476_v25 = vadd.f32 %v460_v57, %v442_v63  ;;  %v203_v26 = vadd.f32 %v187_v11, %v169_v60  ;;  %v1060_v57 = vld [vmem:[#allocation6 + $0x29] ss:$4 sm:$0x3] }
  0x34   :  { %v427_v28 = vmul.f32 %v935_v14, %v1003_v59  ;;  %v461_v29 = vmul.f32 %v941_v18, %v1007_v7  ;;  %v495_v30 = vmul.f32 %v949_v22, %v1009_v8  ;;  %v170_v32 = vmul.f32 %v913_v2, %v1021_v27  ;;  %1694 = vst [vmem:[#allocation11_spill] sm:$0xff] %v1060_v57  ;;  %v1064_v62 = vld [vmem:[#allocation6 + $0x2a] ss:$4 sm:$0x3] }
  0x35   :  { %773 = vrcp.f32 %v525_v17  ;;  %v510_v33 = vadd.f32 %v494_v58, %v476_v25  ;;  %v237_v34 = vadd.f32 %v221_v12, %v203_v26  ;;  %v188_v39 = vmul.f32 %v915_v3, %v1029_v31  ;;  %1695 = vst [vmem:[#allocation12_spill] sm:$0xff] %v1064_v62  ;;  %v1066_v63 = vld [vmem:[#allocation6 + $0x2b] ss:$4 sm:$0x3] }
  0x36   :  { %v443_v42 = vadd.f32 %v427_v28, %v409_v16  ;;  %v222_v45 = vmul.f32 %v925_v9, %v1033_v37  ;;  %v256_v46 = vmul.f32 %v927_v10, %v1035_v38  ;;  %v410_v47 = vmul.f32 %v933_v13, %v1021_v27  ;;  %1696 = vst [vmem:[#allocation13_spill] sm:$0xff] %v1066_v63 }
  0x37   :  { %v526_v48 = vadd.f32 1e-06, %v510_v33  ;;  %v1050_v49 = vadd.f32 %v255_v15, %v237_v34  ;;  %v204_v50 = vadd.f32 %v188_v39, %v170_v32  ;;  %v428_v4 = vmul.f32 %v935_v14, %v1029_v31  ;;  %v1080_v32 = vld [vmem:[#allocation6 + $0x30] ss:$4 sm:$0x3] }
  0x38   :  { %v477_v53 = vadd.f32 %v461_v29, %v443_v42  ;;  %v462_v54 = vmul.f32 %v941_v18, %v1033_v37  ;;  %v496_v56 = vmul.f32 %v949_v22, %v1035_v38  ;;  %v171_v58 = vmul.f32 %v913_v2, %v1054_v52  ;;  %1697 = vst [vmem:[#allocation14_spill] sm:$0xff] %v1080_v32  ;;  %v1088_v42 = vld [vmem:[#allocation6 + $0x31] ss:$4 sm:$0x3] }
  0x39   :  { %775 = vrcp.f32 %v526_v48  ;;  %v238_v60 = vadd.f32 %v222_v45, %v204_v50  ;;  %v444_v61 = vadd.f32 %v428_v4, %v410_v47  ;;  %v189_v11 = vmul.f32 %v915_v3, %v1060_v57  ;;  %1698 = vst [vmem:[#allocation15_spill] sm:$0xff] %v1088_v42  ;;  %v1094_v4 = vld [vmem:[#allocation6 + $0x32] ss:$4 sm:$0x3] }
  0x3a   :  { %v511_v12 = vadd.f32 %v495_v30, %v477_v53  ;;  %v223_v15 = vmul.f32 %v925_v9, %v1064_v62  ;;  %v257_v16 = vmul.f32 %v927_v10, %v1066_v63  ;;  %v411_v17 = vmul.f32 %v933_v13, %v1054_v52  ;;  %1699 = vst [vmem:[#allocation16_spill] sm:$0xff] %v1094_v4  ;;  %v1096_v53 = vld [vmem:[#allocation6 + $0x33] ss:$4 sm:$0x3] }
  0x3b   :  { %v1076_v25 = vadd.f32 %v256_v46, %v238_v60  ;;  %v478_v26 = vadd.f32 %v462_v54, %v444_v61  ;;  %v205_v28 = vadd.f32 %v189_v11, %v171_v58  ;;  %v429_v29 = vmul.f32 %v935_v14, %v1060_v57  ;;  %1700 = vst [vmem:[#allocation17_spill] sm:$0xff] %v1096_v53 }
  0x3c   :  { %v1082_v33 = vpop.eup %771  ;;  %v527_v30 = vadd.f32 1e-06, %v511_v12  ;;  %v463_v34 = vmul.f32 %v941_v18, %v1064_v62  ;;  %v497_v39 = vmul.f32 %v949_v22, %v1066_v63  ;;  %v172_v45 = vmul.f32 %v913_v2, %v1080_v32  ;;  %v1184_v63 = vld [vmem:[#allocation6 + $0x48] ss:$4 sm:$0x3] }
  0x3d   :  { %v572_v46 = vmul.f32 %v1082_v33, %v971_v36  ;;  %v512_v47 = vadd.f32 %v496_v56, %v478_v26  ;;  %v239_v48 = vadd.f32 %v223_v15, %v205_v28  ;;  %v445_v50 = vadd.f32 %v429_v29, %v411_v17  ;;  %v1114_v29 = vld [vmem:[#allocation6 + $0x38] ss:$4 sm:$0x3]  ;;  %1710 = vst [vmem:[#allocation27_spill] sm:$0xff] %v1184_v63 }
  0x3e   :  { %777 = vrcp.f32 %v527_v30  ;;  %v190_v54 = vmul.f32 %v915_v3, %v1088_v42  ;;  %v224_v58 = vmul.f32 %v925_v9, %v1094_v4  ;;  %v258_v60 = vmul.f32 %v927_v10, %v1096_v53  ;;  %1701 = vst [vmem:[#allocation18_spill] sm:$0xff] %v1114_v29 }
  0x3f   :  { %v1104_v61 = vpop.eup %773  ;;  %v732_v36 = vadd.f32 -1.0, %v572_v46  ;;  %v528_v56 = vadd.f32 1e-06, %v512_v47  ;;  %v1106_v11 = vadd.f32 %v257_v16, %v239_v48  ;;  %v479_v12 = vadd.f32 %v463_v34, %v445_v50  ;;  %v1122_v34 = vld [vmem:[#allocation6 + $0x39] ss:$4 sm:$0x3] }
  0x40   :  { %v573_v15 = vmul.f32 %v1104_v61, %v993_v51  ;;  %v206_v17 = vadd.f32 %v190_v54, %v172_v45  ;;  %v412_v26 = vmul.f32 %v933_v13, %v1080_v32  ;;  %v430_v28 = vmul.f32 %v935_v14, %v1088_v42  ;;  %1702 = vst [vmem:[#allocation19_spill] sm:$0xff] %v1122_v34  ;;  %v1124_v45 = vld [vmem:[#allocation6 + $0x3a] ss:$4 sm:$0x3] }
  0x41   :  { %608 = vst.msk [vmem:[#allocation7] ss:$2 sm:$0x3] %vm1040_vm0, %v732_v36  ;;  %779 = vrcp.f32 %v528_v56  ;;  %v513_v30 = vadd.f32 %v497_v39, %v479_v12  ;;  %v464_v16 = vmul.f32 %v941_v18, %v1094_v4  ;;  %v498_v51 = vmul.f32 %v949_v22, %v1096_v53  ;;  %1703 = vst [vmem:[#allocation20_spill] sm:$0xff] %v1124_v45 }
  0x42   :  { %v733_v46 = vadd.f32 -1.0, %v573_v15  ;;  %v240_v47 = vadd.f32 %v224_v58, %v206_v17  ;;  %v446_v48 = vadd.f32 %v430_v28, %v412_v26  ;;  %v1126_v50 = vld [vmem:[#allocation6 + $0x3b] ss:$4 sm:$0x3]  ;;  %v173_v54 = vmul.f32 %v913_v2, %v1114_v29 }
  0x43   :  { %1704 = vst [vmem:[#allocation21_spill] sm:$0xff] %v1126_v50  ;;  %v1130_v36 = vpop.eup %775  ;;  %v529_v39 = vadd.f32 1e-06, %v513_v30  ;;  %v191_v56 = vmul.f32 %v915_v3, %v1122_v34  ;;  %v225_v12 = vmul.f32 %v925_v9, %v1124_v45  ;;  %v259_v53 = vmul.f32 %v927_v10, %v1126_v50  ;;  %v1150_v42 = vld [vmem:[#allocation6 + $0x40] ss:$4 sm:$0x3] }
  0x44   :  { %610 = vst.msk [vmem:[#allocation7 + $0x4] ss:$2 sm:$0x3] %vm1040_vm0, %v733_v46  ;;  %v574_v58 = vmul.f32 %v1130_v36, %v1019_v21  ;;  %v1142_v15 = vadd.f32 %v258_v60, %v240_v47  ;;  %v480_v17 = vadd.f32 %v464_v16, %v446_v48  ;;  %v413_v26 = vmul.f32 %v933_v13, %v1114_v29  ;;  %v1152_v46 = vld [vmem:[#allocation6 + $0x41] ss:$4 sm:$0x3] }
  0x45   :  { %781 = vrcp.f32 %v529_v39  ;;  %v207_v28 = vadd.f32 %v191_v56, %v173_v54  ;;  %v431_v30 = vmul.f32 %v935_v14, %v1122_v34  ;;  %v465_v4 = vmul.f32 %v941_v18, %v1124_v45  ;;  %1705 = vst [vmem:[#allocation22_spill] sm:$0xff] %v1150_v42  ;;  %1706 = vst [vmem:[#allocation23_spill] sm:$0xff] %v1152_v46  ;;  %v1156_v16 = vld [vmem:[#allocation6 + $0x42] ss:$4 sm:$0x3] }
  0x46   :  { %v734_v32 = vadd.f32 -1.0, %v574_v58  ;;  %v514_v21 = vadd.f32 %v498_v51, %v480_v17  ;;  %v499_v60 = vmul.f32 %v949_v22, %v1126_v50  ;;  %1707 = vst [vmem:[#allocation24_spill] sm:$0xff] %v1156_v16  ;;  %v174_v47 = vmul.f32 %v913_v2, %v1150_v42  ;;  %v1160_v39 = vld [vmem:[#allocation6 + $0x43] ss:$4 sm:$0x3] }
  0x47   :  { %v241_v48 = vadd.f32 %v225_v12, %v207_v28  ;;  %v447_v54 = vadd.f32 %v431_v30, %v413_v26  ;;  %1708 = vst [vmem:[#allocation25_spill] sm:$0xff] %v1160_v39  ;;  %v192_v56 = vmul.f32 %v915_v3, %v1152_v46  ;;  %v226_v45 = vmul.f32 %v925_v9, %v1156_v16 }
  0x48   :  { %v1166_v58 = vpop.eup %777  ;;  %612 = vst.msk [vmem:[#allocation7 + $0x8] ss:$2 sm:$0x3] %vm1040_vm0, %v734_v32  ;;  %v530_v51 = vadd.f32 1e-06, %v514_v21  ;;  %v260_v17 = vmul.f32 %v927_v10, %v1160_v39  ;;  %v414_v12 = vmul.f32 %v933_v13, %v1150_v42  ;;  %v432_v26 = vmul.f32 %v935_v14, %v1152_v46 }
  0x49   :  { %1709 = vst [vmem:[#allocation26_spill] sm:$0xff] %v1166_v58  ;;  %v575_v28 = vmul.f32 %v1166_v58, %v1050_v49  ;;  %v1178_v30 = vadd.f32 %v259_v53, %v241_v48  ;;  %v481_v50 = vadd.f32 %v465_v4, %v447_v54  ;;  %v208_v34 = vadd.f32 %v192_v56, %v174_v47  ;;  %v1186_v42 = vld [vmem:[#allocation6 + $0x49] ss:$4 sm:$0x3] }
  0x4a   :  { %783 = vrcp.f32 %v530_v51  ;;  %v448_v29 = vadd.f32 %v432_v26, %v414_v12  ;;  %v466_v32 = vmul.f32 %v941_v18, %v1156_v16  ;;  %v500_v21 = vmul.f32 %v949_v22, %v1160_v39  ;;  %1711 = vst [vmem:[#allocation28_spill] sm:$0xff] %v1186_v42  ;;  %v1190_v48 = vld [vmem:[#allocation6 + $0x4a] ss:$4 sm:$0x3] }
  0x4b   :  { %v1188_v46 = vpop.eup %779  ;;  %v735_v62 = vadd.f32 -1.0, %v575_v28  ;;  %v515_v49 = vadd.f32 %v499_v60, %v481_v50  ;;  %v242_v53 = vadd.f32 %v226_v45, %v208_v34  ;;  %1713 = vst [vmem:[#allocation30_spill] sm:$0xff] %v1190_v48  ;;  %v175_v4 = vmul.f32 %v913_v2, %v1184_v63  ;;  %v1196_v56 = vld [vmem:[#allocation6 + $0x4b] ss:$4 sm:$0x3] }
  0x4c   :  { %1712 = vst [vmem:[#allocation29_spill] sm:$0xff] %v1188_v46  ;;  %v576_v47 = vmul.f32 %v1188_v46, %v1076_v25  ;;  %v482_v54 = vadd.f32 %v466_v32, %v448_v29  ;;  %1714 = vst [vmem:[#allocation31_spill] sm:$0xff] %v1196_v56  ;;  %v193_v51 = vmul.f32 %v915_v3, %v1186_v42  ;;  %v1212_v32 = vld [vmem:[#allocation6 + $0x50] ss:$4 sm:$0x3] }
  0x4d   :  { %v227_v12 = vmul.f32 %v925_v9, %v1190_v48  ;;  %614 = vst.msk [vmem:[#allocation7 + $0xc] ss:$2 sm:$0x3] %vm1040_vm0, %v735_v62  ;;  %v531_v34 = vadd.f32 1e-06, %v515_v49  ;;  %v1204_v45 = vadd.f32 %v260_v17, %v242_v53  ;;  %v261_v50 = vmul.f32 %v927_v10, %v1196_v56  ;;  %1715 = vst [vmem:[#allocation32_spill] sm:$0xff] %v1212_v32 }
  0x4e   :  { %v415_v25 = vmul.f32 %v933_v13, %v1184_v63  ;;  %v736_v29 = vadd.f32 -1.0, %v576_v47  ;;  %v516_v60 = vadd.f32 %v500_v21, %v482_v54  ;;  %v209_v26 = vadd.f32 %v193_v51, %v175_v4  ;;  %v1220_v49 = vld [vmem:[#allocation6 + $0x51] ss:$4 sm:$0x3] }
  0x4f   :  { %v433_v28 = vmul.f32 %v935_v14, %v1186_v42  ;;  %v1214_v39 = vpop.eup %781  ;;  %785 = vrcp.f32 %v531_v34  ;;  %v467_v62 = vmul.f32 %v941_v18, %v1190_v48  ;;  %v501_v17 = vmul.f32 %v949_v22, %v1196_v56  ;;  %1717 = vst [vmem:[#allocation34_spill] sm:$0xff] %v1220_v49  ;;  %v1222_v53 = vld [vmem:[#allocation6 + $0x52] ss:$4 sm:$0x3] }
  0x50   :  { %1716 = vst [vmem:[#allocation33_spill] sm:$0xff] %v1214_v39  ;;  %1718 = vst [vmem:[#allocation35_spill] sm:$0xff] %v1222_v53  ;;  %v176_v21 = vmul.f32 %v913_v2, %v1212_v32  ;;  %v577_v4 = vmul.f32 %v1214_v39, %v1106_v11  ;;  %v532_v47 = vadd.f32 1e-06, %v516_v60  ;;  %v243_v54 = vadd.f32 %v227_v12, %v209_v26 }
  0x51   :  { %616 = vst.msk [vmem:[#allocation7 + $0x10] ss:$2 sm:$0x3] %vm1040_vm0, %v736_v29  ;;  %v449_v51 = vadd.f32 %v433_v28, %v415_v25  ;;  %v1230_v34 = vld [vmem:[#allocation6 + $0x53] ss:$4 sm:$0x3]  ;;  %v194_v56 = vmul.f32 %v915_v3, %v1220_v49  ;;  %v228_v48 = vmul.f32 %v925_v9, %v1222_v53  ;;  %v416_v29 = vmul.f32 %v933_v13, %v1212_v32 }
  0x52   :  { %1719 = vst [vmem:[#allocation36_spill] sm:$0xff] %v1230_v34  ;;  %v262_v42 = vmul.f32 %v927_v10, %v1230_v34  ;;  %v737_v63 = vadd.f32 -1.0, %v577_v4  ;;  %787 = vrcp.f32 %v532_v47  ;;  %v1240_v11 = vadd.f32 %v261_v50, %v243_v54  ;;  %v1242_v25 = vld [vmem:[#allocation6 + $0x58] ss:$4 sm:$0x3] }
  0x53   :  { %v483_v12 = vadd.f32 %v467_v62, %v449_v51  ;;  %v210_v60 = vadd.f32 %v194_v56, %v176_v21  ;;  %v434_v26 = vmul.f32 %v935_v14, %v1220_v49  ;;  %v468_v28 = vmul.f32 %v941_v18, %v1222_v53  ;;  %v1250_v39 = vld [vmem:[#allocation6 + $0x59] ss:$4 sm:$0x3]  ;;  %v1252_v32 = vld [vmem:[#allocation6 + $0x5a] ss:$4 sm:$0x3] }
  0x54   :  { %v502_v16 = vmul.f32 %v949_v22, %v1230_v34  ;;  %1720 = vst [vmem:[#allocation37_spill] sm:$0xff] %v1250_v39  ;;  %1721 = vst [vmem:[#allocation38_spill] sm:$0xff] %v1252_v32  ;;  %v1254_v4 = vpop.eup %783  ;;  %v1258_v56 = vld [vmem:[#allocation6 + $0x5b] ss:$4 sm:$0x3]  ;;  %v177_v62 = vmul.f32 %v913_v2, %v1242_v25  ;;  %v195_v21 = vmul.f32 %v915_v3, %v1250_v39 }
  0x55   :  { %618 = vst.msk [vmem:[#allocation7 + $0x14] ss:$2 sm:$0x3] %vm1040_vm0, %v737_v63  ;;  %v517_v50 = vadd.f32 %v501_v17, %v483_v12  ;;  %1722 = vst [vmem:[#allocation39_spill] sm:$0xff] %v1258_v56  ;;  %v229_v47 = vmul.f32 %v925_v9, %v1252_v32  ;;  %v578_v54 = vmul.f32 %v1254_v4, %v1142_v15 }
  0x56   :  { %v244_v51 = vadd.f32 %v228_v48, %v210_v60  ;;  %v450_v34 = vadd.f32 %v434_v26, %v416_v29  ;;  %v263_v63 = vmul.f32 %v927_v10, %v1258_v56  ;;  %v211_v12 = vadd.f32 %v195_v21, %v177_v62  ;;  %v1278_v48 = vld [vmem:[#allocation6 + $0x60] ss:$4 sm:$0x3]  ;;  %v1284_v62 = vld [vmem:[#allocation6 + $0x62] ss:$4 sm:$0x3] }
  0x57   :  { %v533_v17 = vadd.f32 1e-06, %v517_v50  ;;  %v417_v53 = vmul.f32 %v933_v13, %v1242_v25  ;;  %v435_v49 = vmul.f32 %v935_v14, %v1250_v39  ;;  %v738_v46 = vadd.f32 -1.0, %v578_v54  ;;  %1723 = vst [vmem:[#allocation40_spill] sm:$0xff] %v1278_v48  ;;  %1725 = vst [vmem:[#allocation42_spill] sm:$0xff] %v1284_v62 }
  0x58   :  { %v1274_v58 = vadd.f32 %v262_v42, %v244_v51  ;;  %v484_v57 = vadd.f32 %v468_v28, %v450_v34  ;;  %v469_v15 = vmul.f32 %v941_v18, %v1252_v32  ;;  %v245_v29 = vadd.f32 %v229_v47, %v211_v12  ;;  %v1282_v50 = vld [vmem:[#allocation6 + $0x61] ss:$4 sm:$0x3]  ;;  %v1290_v34 = vld [vmem:[#allocation6 + $0x63] ss:$4 sm:$0x3] }
  0x59   :  { %789 = vrcp.f32 %v533_v17  ;;  %v451_v60 = vadd.f32 %v435_v49, %v417_v53  ;;  %v503_v26 = vmul.f32 %v949_v22, %v1258_v56  ;;  %1724 = vst [vmem:[#allocation41_spill] sm:$0xff] %v1282_v50  ;;  %v1286_v21 = vpop.eup %785  ;;  %620 = vst.msk [vmem:[#allocation7 + $0x18] ss:$2 sm:$0x3] %vm1040_vm0, %v738_v46  ;;  %v178_v28 = vmul.f32 %v913_v2, %v1278_v48 }
  0x5a   :  { %v518_v42 = vadd.f32 %v502_v16, %v484_v57  ;;  %1726 = vst [vmem:[#allocation43_spill] sm:$0xff] %v1290_v34  ;;  %v196_v49 = vmul.f32 %v915_v3, %v1282_v50  ;;  %v230_v53 = vmul.f32 %v925_v9, %v1284_v62  ;;  %v579_v47 = vmul.f32 %v1286_v21, %v1178_v30 }
  0x5b   :  { %v1300_v54 = vadd.f32 %v263_v63, %v245_v29  ;;  %v485_v51 = vadd.f32 %v469_v15, %v451_v60  ;;  %v264_v57 = vmul.f32 %v927_v10, %v1290_v34  ;;  %v418_v17 = vmul.f32 %v933_v13, %v1278_v48  ;;  %v1314_v15 = vld [vmem:[#allocation6 + $0x68] ss:$4 sm:$0x3] }
  0x5c   :  { %v534_v46 = vadd.f32 1e-06, %v518_v42  ;;  %v212_v16 = vadd.f32 %v196_v49, %v178_v28  ;;  %v436_v12 = vmul.f32 %v935_v14, %v1282_v50  ;;  %v1308_v56 = vpop.eup %787  ;;  %v739_v32 = vadd.f32 -1.0, %v579_v47  ;;  %1727 = vst [vmem:[#allocation44_spill] sm:$0xff] %v1314_v15 }
  0x5d   :  { %v519_v39 = vadd.f32 %v503_v26, %v485_v51  ;;  %v470_v30 = vmul.f32 %v941_v18, %v1284_v62  ;;  %v504_v63 = vmul.f32 %v949_v22, %v1290_v34  ;;  %v580_v29 = vmul.f32 %v1308_v56, %v1204_v45  ;;  %v1318_v28 = vld [vmem:[#allocation6 + $0x69] ss:$4 sm:$0x3]  ;;  %v1320_v49 = vld [vmem:[#allocation6 + $0x6a] ss:$4 sm:$0x3] }
  0x5e   :  { %791 = vrcp.f32 %v534_v46  ;;  %v246_v60 = vadd.f32 %v230_v53, %v212_v16  ;;  %v452_v42 = vadd.f32 %v436_v12, %v418_v17  ;;  %1728 = vst [vmem:[#allocation45_spill] sm:$0xff] %v1318_v28  ;;  %1729 = vst [vmem:[#allocation46_spill] sm:$0xff] %v1320_v49  ;;  %v1324_v47 = vld [vmem:[#allocation6 + $0x6b] ss:$4 sm:$0x3]  ;;  %v179_v51 = vmul.f32 %v913_v2, %v1314_v15 }
  0x5f   :  { %622 = vst.msk [vmem:[#allocation7 + $0x1c] ss:$2 sm:$0x3] %vm1040_vm0, %v739_v32  ;;  %v535_v26 = vadd.f32 1e-06, %v519_v39  ;;  %1730 = vst [vmem:[#allocation47_spill] sm:$0xff] %v1324_v47  ;;  %v197_v34 = vmul.f32 %v915_v3, %v1318_v28  ;;  %v231_v45 = vmul.f32 %v925_v9, %v1320_v49  ;;  %v265_v17 = vmul.f32 %v927_v10, %v1324_v47 }
  0x60   :  { %v740_v53 = vadd.f32 -1.0, %v580_v29  ;;  %v1332_v46 = vadd.f32 %v264_v57, %v246_v60  ;;  %v486_v16 = vadd.f32 %v470_v30, %v452_v42  ;;  %v419_v32 = vmul.f32 %v933_v13, %v1314_v15  ;;  %v1340_v62 = vld [vmem:[#allocation6 + $0x70] ss:$4 sm:$0x3] }
  0x61   :  { %793 = vrcp.f32 %v535_v26  ;;  %v213_v39 = vadd.f32 %v197_v34, %v179_v51  ;;  %v437_v12 = vmul.f32 %v935_v14, %v1318_v28  ;;  %1731 = vst [vmem:[#allocation48_spill] sm:$0xff] %v1340_v62  ;;  %v1342_v50 = vld [vmem:[#allocation6 + $0x71] ss:$4 sm:$0x3]  ;;  %v471_v30 = vmul.f32 %v941_v18, %v1320_v49 }
  0x62   :  { %624 = vst.msk [vmem:[#allocation7 + $0x20] ss:$2 sm:$0x3] %vm1040_vm0, %v740_v53  ;;  %v520_v57 = vadd.f32 %v504_v63, %v486_v16  ;;  %v505_v34 = vmul.f32 %v949_v22, %v1324_v47  ;;  %v1350_v29 = vld [vmem:[#allocation6 + $0x72] ss:$4 sm:$0x3]  ;;  %v180_v42 = vmul.f32 %v913_v2, %v1340_v62  ;;  %v198_v63 = vmul.f32 %v915_v3, %v1342_v50 }
  0x63   :  { %v1352_v60 = vld [vmem:[#allocation6 + $0x73] ss:$4 sm:$0x3]  ;;  %v1356_v26 = vpop.eup %789  ;;  %v247_v51 = vadd.f32 %v231_v45, %v213_v39  ;;  %v453_v28 = vadd.f32 %v437_v12, %v419_v32  ;;  %v232_v53 = vmul.f32 %v925_v9, %v1350_v29  ;;  %v1362_v16 = vld [vmem:[#allocation6 + $0x78] ss:$4 sm:$0x3]  ;;  %v420_v45 = vmul.f32 %v933_v13, %v1340_v62 }
  0x64   :  { %1732 = vst [vmem:[#allocation49_spill] sm:$0xff] %v1356_v26  ;;  %v581_v47 = vmul.f32 %v1356_v26, %v1240_v11  ;;  %v536_v49 = vadd.f32 1e-06, %v520_v57  ;;  %v266_v15 = vmul.f32 %v927_v10, %v1352_v60  ;;  %v214_v12 = vadd.f32 %v198_v63, %v180_v42  ;;  %v1386_v26 = vld [vmem:[#allocation6 + $0x79] ss:$4 sm:$0x3] }
  0x65   :  { %v1374_v39 = vadd.f32 %v265_v17, %v247_v51  ;;  %v487_v32 = vadd.f32 %v471_v30, %v453_v28  ;;  %v438_v48 = vmul.f32 %v935_v14, %v1342_v50  ;;  %v472_v57 = vmul.f32 %v941_v18, %v1350_v29  ;;  %v1388_v42 = vld [vmem:[#allocation6 + $0x7a] ss:$4 sm:$0x3]  ;;  %v1390_v51 = vld [vmem:[#allocation6 + $0x7b] ss:$4 sm:$0x3] }
  0x66   :  { %v741_v11 = vadd.f32 -1.0, %v581_v47  ;;  %795 = vrcp.f32 %v536_v49  ;;  %v506_v62 = vmul.f32 %v949_v22, %v1352_v60  ;;  %v248_v28 = vadd.f32 %v232_v53, %v214_v12 }
  0x67   :  { %v521_v17 = vadd.f32 %v505_v34, %v487_v32  ;;  %v454_v30 = vadd.f32 %v438_v48, %v420_v45  ;;  %v181_v63 = vmul.f32 %v913_v2, %v1362_v16  ;;  %v199_v49 = vmul.f32 %v915_v3, %v1386_v26 }
  0x68   :  { %v1394_v47 = vpop.eup %791  ;;  %626 = vst.msk [vmem:[#allocation7 + $0x24] ss:$2 sm:$0x3] %vm1040_vm0, %v741_v11  ;;  %v233_v34 = vmul.f32 %v925_v9, %v1388_v42  ;;  %v267_v48 = vmul.f32 %v927_v10, %v1390_v51  ;;  %v421_v53 = vmul.f32 %v933_v13, %v1362_v16  ;;  %v1408_v32 = vadd.f32 %v266_v15, %v248_v28 }
  0x69   :  { %v582_v2 = vmul.f32 %v1394_v47, %v1274_v58  ;;  %v537_v45 = vadd.f32 1e-06, %v521_v17  ;;  %v488_v12 = vadd.f32 %v472_v57, %v454_v30  ;;  %v215_v11 = vadd.f32 %v199_v49, %v181_v63 }
  0x6a   :  { %v439_v3 = vmul.f32 %v935_v14, %v1386_v26  ;;  %v473_v9 = vmul.f32 %v941_v18, %v1388_v42  ;;  %v507_v10 = vmul.f32 %v949_v22, %v1390_v51  ;;  %v1419_v17 = vstv %s1364_s1 }
  0x6b   :  { %v1416_v13 = vpop.eup %793  ;;  %v742_v58 = vadd.f32 -1.0, %v582_v2  ;;  %797 = vrcp.f32 %v537_v45  ;;  %v522_v15 = vadd.f32 %v506_v62, %v488_v12  ;;  %v249_v28 = vadd.f32 %v233_v34, %v215_v11 }
  0x6c   :  { %v583_v57 = vmul.f32 %v1416_v13, %v1300_v54  ;;  %v455_v30 = vadd.f32 %v439_v3, %v421_v53  ;;  %v286_v14 = vmul.f32 %v1419_v17, %v909_v0  ;;  %v1428_v22 = vstv %s1372_s12 }
  0x6d   :  { %628 = vst.msk [vmem:[#allocation7 + $0x28] ss:$2 sm:$0x3] %vm1040_vm0, %v742_v58  ;;  %v538_v18 = vadd.f32 1e-06, %v522_v15  ;;  %v1431_v63 = vstv %s1378_s13  ;;  %v1434_v49 = vstv %s1380_s14  ;;  %v1436_v2 = vadd.f32 %v267_v48, %v249_v28 }
  0x6e   :  { %v743_v62 = vadd.f32 -1.0, %v583_v57  ;;  %v489_v45 = vadd.f32 %v473_v9, %v455_v30  ;;  %v304_v54 = vmul.f32 %v1428_v22, %v911_v1  ;;  %v338_v0 = vmul.f32 %v1431_v63, %v917_v5 }
  0x6f   :  { %799 = vrcp.f32 %v538_v18  ;;  %v372_v34 = vmul.f32 %v1434_v49, %v919_v6  ;;  %v287_v53 = vmul.f32 %v1419_v17, %v943_v19  ;;  %v305_v1 = vmul.f32 %v1428_v22, %v945_v20 }
  0x70   :  { %v1446_v12 = vpop.eup %795  ;;  %630 = vst.msk [vmem:[#allocation7 + $0x2c] ss:$2 sm:$0x3] %vm1040_vm0, %v743_v62  ;;  %v523_v48 = vadd.f32 %v507_v10, %v489_v45  ;;  %v320_v11 = vadd.f32 %v304_v54, %v286_v14  ;;  %v339_v3 = vmul.f32 %v1431_v63, %v951_v23  ;;  %v373_v6 = vmul.f32 %v1434_v49, %v953_v24 }
  0x71   :  { %v584_v5 = vmul.f32 %v1446_v12, %v1332_v46  ;;  %v288_v19 = vmul.f32 %v1419_v17, %v969_v35  ;;  %v306_v9 = vmul.f32 %v1428_v22, %v977_v40  ;;  %v321_v15 = vadd.f32 %v305_v1, %v287_v53 }
  0x72   :  { %v539_v10 = vadd.f32 1e-06, %v523_v48  ;;  %v354_v58 = vadd.f32 %v338_v0, %v320_v11  ;;  %v340_v20 = vmul.f32 %v1431_v63, %v979_v43  ;;  %v374_v46 = vmul.f32 %v1434_v49, %v981_v44 }
  0x73   :  { %v744_v57 = vadd.f32 -1.0, %v584_v5  ;;  %v322_v23 = vadd.f32 %v306_v9, %v288_v19  ;;  %v289_v24 = vmul.f32 %v1419_v17, %v997_v55  ;;  %v355_v35 = vadd.f32 %v339_v3, %v321_v15  ;;  %v1734_v5 = vld [vmem:[#allocation12_spill] sm:$0xff]  ;;  %v1735_v9 = vld [vmem:[#allocation13_spill] sm:$0xff]  ;;  %v1736_v15 = vld [vmem:[#allocation26_spill] sm:$0xff] }
  0x74   :  { %801 = vrcp.f32 %v539_v10  ;;  %v388_v28 = vadd.f32 %v372_v34, %v354_v58  ;;  %v307_v40 = vmul.f32 %v1428_v22, %v1003_v59  ;;  %v341_v14 = vmul.f32 %v1431_v63, %v1007_v7 }
  0x75   :  { %v1470_v30 = vpop.eup %797  ;;  %632 = vst.msk [vmem:[#allocation7 + $0x30] ss:$2 sm:$0x3] %vm1040_vm0, %v744_v57  ;;  %v356_v43 = vadd.f32 %v340_v20, %v322_v23  ;;  %v375_v44 = vmul.f32 %v1434_v49, %v1009_v8  ;;  %v290_v55 = vmul.f32 %v1419_v17, %v1021_v27  ;;  %v389_v62 = vadd.f32 %v373_v6, %v355_v35  ;;  %v1737_v20 = vld [vmem:[#allocation14_spill] sm:$0xff]  ;;  %v1738_v23 = vld [vmem:[#allocation15_spill] sm:$0xff]  ;;  %v1739_v35 = vld [vmem:[#allocation16_spill] sm:$0xff] }
  0x76   :  { %v585_v18 = vmul.f32 %v1470_v30, %v1374_v39  ;;  %v639_v59 = vmul.f32 %v1082_v33, %v388_v28  ;;  %v323_v45 = vadd.f32 %v307_v40, %v289_v24  ;;  %v308_v0 = vmul.f32 %v1428_v22, %v1029_v31  ;;  %v1733_v31 = vld [vmem:[#allocation11_spill] sm:$0xff] }
  0x77   :  { %v390_v54 = vadd.f32 %v374_v46, %v356_v43  ;;  %v342_v7 = vmul.f32 %v1431_v63, %v1033_v37  ;;  %v376_v8 = vmul.f32 %v1434_v49, %v1035_v38  ;;  %v640_v27 = vmul.f32 %v1104_v61, %v389_v62  ;;  %v1740_v43 = vld [vmem:[#allocation17_spill] sm:$0xff] }
  0x78   :  { %v745_v34 = vadd.f32 -1.0, %v585_v18  ;;  %v748_v53 = vadd.f32 -1.0, %v639_v59  ;;  %v357_v48 = vadd.f32 %v341_v14, %v323_v45  ;;  %v324_v11 = vadd.f32 %v308_v0, %v290_v55  ;;  %v1741_v59 = vld [vmem:[#allocation18_spill] sm:$0xff]  ;;  %v1742_v45 = vld [vmem:[#allocation19_spill] sm:$0xff] }
  0x79   :  { %v1490_v39 = vpop.eup %799  ;;  %v641_v33 = vmul.f32 %v1130_v36, %v390_v54  ;;  %v291_v1 = vmul.f32 %v1419_v17, %v1054_v52  ;;  %v309_v3 = vmul.f32 %v1428_v22, %v1733_v31  ;;  %v749_v38 = vadd.f32 -1.0, %v640_v27  ;;  %v1746_v31 = vld [vmem:[#allocation22_spill] sm:$0xff] }
  0x7a   :  { %634 = vst.msk [vmem:[#allocation7 + $0x34] ss:$2 sm:$0x3] %vm1040_vm0, %v745_v34  ;;  %v586_v37 = vmul.f32 %v1490_v39, %v1408_v32  ;;  %672 = vst.msk [vmem:[#allocation7 + $0x1] ss:$2 sm:$0x3] %vm1040_vm0, %v748_v53  ;;  %v391_v61 = vadd.f32 %v375_v44, %v357_v48  ;;  %v343_v36 = vmul.f32 %v1431_v63, %v1734_v5 }
  0x7b   :  { %v750_v6 = vadd.f32 -1.0, %v641_v33  ;;  %v358_v19 = vadd.f32 %v342_v7, %v324_v11  ;;  %v325_v52 = vadd.f32 %v309_v3, %v291_v1  ;;  %v377_v10 = vmul.f32 %v1434_v49, %v1735_v9  ;;  %674 = vst.msk [vmem:[#allocation7 + $0x5] ss:$2 sm:$0x3] %vm1040_vm0, %v749_v38  ;;  %v1743_v7 = vld [vmem:[#allocation29_spill] sm:$0xff]  ;;  %v1744_v53 = vld [vmem:[#allocation20_spill] sm:$0xff] }
  0x7c   :  { %v746_v58 = vadd.f32 -1.0, %v586_v37  ;;  %v642_v32 = vmul.f32 %v1736_v15, %v391_v61  ;;  %v292_v57 = vmul.f32 %v1419_v17, %v1737_v20  ;;  %v310_v46 = vmul.f32 %v1428_v22, %v1738_v23  ;;  %v1745_v11 = vld [vmem:[#allocation21_spill] sm:$0xff]  ;;  %v1748_v5 = vld [vmem:[#allocation23_spill] sm:$0xff]  ;;  %v1752_v23 = vld [vmem:[#allocation28_spill] sm:$0xff] }
  0x7d   :  { %676 = vst.msk [vmem:[#allocation7 + $0x9] ss:$2 sm:$0x3] %vm1040_vm0, %v750_v6  ;;  %v392_v24 = vadd.f32 %v376_v8, %v358_v19  ;;  %v359_v28 = vadd.f32 %v343_v36, %v325_v52  ;;  %v344_v40 = vmul.f32 %v1431_v63, %v1739_v35  ;;  %v378_v14 = vmul.f32 %v1434_v49, %v1740_v43  ;;  %v1749_v52 = vld [vmem:[#allocation24_spill] sm:$0xff]  ;;  %v1751_v20 = vld [vmem:[#allocation27_spill] sm:$0xff]  ;;  %v1753_v35 = vld [vmem:[#allocation30_spill] sm:$0xff] }
  0x7e   :  { %v1520_v44 = vpop.eup %801  ;;  %636 = vst.msk [vmem:[#allocation7 + $0x38] ss:$2 sm:$0x3] %vm1040_vm0, %v746_v58  ;;  %v751_v55 = vadd.f32 -1.0, %v642_v32  ;;  %v326_v18 = vadd.f32 %v310_v46, %v292_v57  ;;  %v293_v62 = vmul.f32 %v1419_v17, %v1741_v59  ;;  %v311_v54 = vmul.f32 %v1428_v22, %v1742_v45  ;;  %v1754_v43 = vld [vmem:[#allocation31_spill] sm:$0xff]  ;;  %v1755_v59 = vld [vmem:[#allocation32_spill] sm:$0xff] }
  0x7f   :  { %v587_v0 = vmul.f32 %v1520_v44, %v1436_v2  ;;  %v643_v8 = vmul.f32 %v1743_v7, %v392_v24  ;;  %v393_v34 = vadd.f32 %v377_v10, %v359_v28  ;;  %v345_v27 = vmul.f32 %v1431_v63, %v1744_v53  ;;  %v1747_v2 = vld [vmem:[#allocation33_spill] sm:$0xff]  ;;  %v1756_v45 = vld [vmem:[#allocation34_spill] sm:$0xff]  ;;  %v1757_v7 = vld [vmem:[#allocation35_spill] sm:$0xff] }
  0x80   :  { %678 = vst.msk [vmem:[#allocation7 + $0xd] ss:$2 sm:$0x3] %vm1040_vm0, %v751_v55  ;;  %v360_v48 = vadd.f32 %v344_v40, %v326_v18  ;;  %v327_v33 = vadd.f32 %v311_v54, %v293_v62  ;;  %v379_v1 = vmul.f32 %v1434_v49, %v1745_v11  ;;  %v294_v3 = vmul.f32 %v1419_v17, %v1746_v31  ;;  %v1750_v10 = vld [vmem:[#allocation25_spill] sm:$0xff] }
  0x81   :  { %v747_v37 = vadd.f32 -1.0, %v587_v0  ;;  %v752_v38 = vadd.f32 -1.0, %v643_v8  ;;  %v644_v61 = vmul.f32 %v1747_v2, %v393_v34  ;;  %v312_v36 = vmul.f32 %v1428_v22, %v1748_v5  ;;  %v1758_v34 = vld [vmem:[#allocation36_spill] sm:$0xff]  ;;  %v1759_v31 = vld [vmem:[#allocation37_spill] sm:$0xff] }
  0x82   :  { %v394_v6 = vadd.f32 %v378_v14, %v360_v48  ;;  %v361_v19 = vadd.f32 %v345_v27, %v327_v33  ;;  %v346_v9 = vmul.f32 %v1431_v63, %v1749_v52  ;;  %v380_v58 = vmul.f32 %v1434_v49, %v1750_v10  ;;  %v1763_v52 = vld [vmem:[#allocation41_spill] sm:$0xff]  ;;  %v1764_v10 = vld [vmem:[#allocation42_spill] sm:$0xff] }
  0x83   :  { %638 = vst.msk [vmem:[#allocation7 + $0x3c] ss:$2 sm:$0x3] %vm1040_vm0, %v747_v37  ;;  %680 = vst.msk [vmem:[#allocation7 + $0x11] ss:$2 sm:$0x3] %vm1040_vm0, %v752_v38  ;;  %v328_v32 = vadd.f32 %v312_v36, %v294_v3  ;;  %v295_v57 = vmul.f32 %v1419_v17, %v1751_v20  ;;  %v313_v46 = vmul.f32 %v1428_v22, %v1752_v23 }
  0x84   :  { %v753_v15 = vadd.f32 -1.0, %v644_v61  ;;  %v645_v24 = vmul.f32 %v1254_v4, %v394_v6  ;;  %v395_v28 = vadd.f32 %v379_v1, %v361_v19  ;;  %v347_v40 = vmul.f32 %v1431_v63, %v1753_v35  ;;  %v1761_v38 = vld [vmem:[#allocation39_spill] sm:$0xff]  ;;  %v1762_v6 = vld [vmem:[#allocation40_spill] sm:$0xff] }
  0x85   :  { %v381_v14 = vmul.f32 %v1434_v49, %v1754_v43  ;;  %v362_v55 = vadd.f32 %v346_v9, %v328_v32  ;;  %v329_v18 = vadd.f32 %v313_v46, %v295_v57  ;;  %v296_v62 = vmul.f32 %v1419_v17, %v1755_v59  ;;  %v1767_v46 = vld [vmem:[#allocation44_spill] sm:$0xff] }
  0x86   :  { %682 = vst.msk [vmem:[#allocation7 + $0x15] ss:$2 sm:$0x3] %vm1040_vm0, %v753_v15  ;;  %v314_v54 = vmul.f32 %v1428_v22, %v1756_v45  ;;  %v754_v0 = vadd.f32 -1.0, %v645_v24  ;;  %v646_v4 = vmul.f32 %v1286_v21, %v395_v28  ;;  %v348_v8 = vmul.f32 %v1431_v63, %v1757_v7  ;;  %v1760_v21 = vld [vmem:[#allocation38_spill] sm:$0xff]  ;;  %v1765_v15 = vld [vmem:[#allocation43_spill] sm:$0xff] }
  0x87   :  { %v382_v53 = vmul.f32 %v1434_v49, %v1758_v34  ;;  %v396_v27 = vadd.f32 %v380_v58, %v362_v55  ;;  %v363_v48 = vadd.f32 %v347_v40, %v329_v18  ;;  %v297_v11 = vmul.f32 %v1419_v17, %v1242_v25  ;;  %v1768_v40 = vld [vmem:[#allocation45_spill] sm:$0xff] }
  0x88   :  { %v330_v33 = vadd.f32 %v314_v54, %v296_v62  ;;  %684 = vst.msk [vmem:[#allocation7 + $0x19] ss:$2 sm:$0x3] %vm1040_vm0, %v754_v0  ;;  %v755_v1 = vadd.f32 -1.0, %v646_v4  ;;  %v315_v3 = vmul.f32 %v1428_v22, %v1759_v31  ;;  %v349_v37 = vmul.f32 %v1431_v63, %v1760_v21  ;;  %v1770_v62 = vld [vmem:[#allocation47_spill] sm:$0xff]  ;;  %v1771_v54 = vld [vmem:[#allocation48_spill] sm:$0xff] }
  0x89   :  { %v383_v2 = vmul.f32 %v1434_v49, %v1761_v38  ;;  %v647_v61 = vmul.f32 %v1308_v56, %v396_v27  ;;  %v397_v5 = vadd.f32 %v381_v14, %v363_v48  ;;  %v298_v25 = vmul.f32 %v1419_v17, %v1762_v6  ;;  %v1766_v56 = vld [vmem:[#allocation49_spill] sm:$0xff]  ;;  %v1769_v14 = vld [vmem:[#allocation46_spill] sm:$0xff] }
  0x8a   :  { %v364_v36 = vadd.f32 %v348_v8, %v330_v33  ;;  %686 = vst.msk [vmem:[#allocation7 + $0x1d] ss:$2 sm:$0x3] %vm1040_vm0, %v755_v1  ;;  %v331_v19 = vadd.f32 %v315_v3, %v297_v11  ;;  %v316_v9 = vmul.f32 %v1428_v22, %v1763_v52  ;;  %v350_v58 = vmul.f32 %v1431_v63, %v1764_v10 }
  0x8b   :  { %v384_v32 = vmul.f32 %v1434_v49, %v1765_v15  ;;  %v756_v20 = vadd.f32 -1.0, %v647_v61  ;;  %v648_v57 = vmul.f32 %v1766_v56, %v397_v5  ;;  %v299_v24 = vmul.f32 %v1419_v17, %v1767_v46 }
  0x8c   :  { %v398_v23 = vadd.f32 %v382_v53, %v364_v36  ;;  %v365_v28 = vadd.f32 %v349_v37, %v331_v19  ;;  %v332_v35 = vadd.f32 %v316_v9, %v298_v25  ;;  %v317_v43 = vmul.f32 %v1428_v22, %v1768_v40 }
  0x8d   :  { %v351_v55 = vmul.f32 %v1431_v63, %v1769_v14  ;;  %688 = vst.msk [vmem:[#allocation7 + $0x21] ss:$2 sm:$0x3] %vm1040_vm0, %v756_v20  ;;  %v757_v18 = vadd.f32 -1.0, %v648_v57  ;;  %v385_v45 = vmul.f32 %v1434_v49, %v1770_v62  ;;  %v300_v0 = vmul.f32 %v1419_v17, %v1771_v54 }
  0x8e   :  { %v649_v59 = vmul.f32 %v1394_v47, %v398_v23  ;;  %v399_v4 = vadd.f32 %v383_v2, %v365_v28  ;;  %v366_v7 = vadd.f32 %v350_v58, %v332_v35  ;;  %v333_v8 = vadd.f32 %v317_v43, %v299_v24 }
  0x8f   :  { %v318_v34 = vmul.f32 %v1428_v22, %v1342_v50  ;;  %690 = vst.msk [vmem:[#allocation7 + $0x25] ss:$2 sm:$0x3] %vm1040_vm0, %v757_v18  ;;  %v352_v27 = vmul.f32 %v1431_v63, %v1350_v29  ;;  %v386_v47 = vmul.f32 %v1434_v49, %v1352_v60  ;;  %v301_v48 = vmul.f32 %v1419_v17, %v1362_v16 }
  0x90   :  { %v758_v53 = vadd.f32 -1.0, %v649_v59  ;;  %v650_v33 = vmul.f32 %v1416_v13, %v399_v4  ;;  %v400_v11 = vadd.f32 %v384_v32, %v366_v7  ;;  %v367_v1 = vadd.f32 %v351_v55, %v333_v8 }
  0x91   :  { %v334_v31 = vadd.f32 %v318_v34, %v300_v0  ;;  %v319_v50 = vmul.f32 %v1428_v22, %v1386_v26  ;;  %v353_v29 = vmul.f32 %v1431_v63, %v1388_v42  ;;  %v387_v13 = vmul.f32 %v1434_v49, %v1390_v51 }
  0x92   :  { %692 = vst.msk [vmem:[#allocation7 + $0x29] ss:$2 sm:$0x3] %vm1040_vm0, %v758_v53  ;;  %v759_v3 = vadd.f32 -1.0, %v650_v33  ;;  %v651_v60 = vmul.f32 %v1446_v12, %v400_v11  ;;  %v401_v21 = vadd.f32 %v385_v45, %v367_v1 }
  0x93   :  { %v368_v37 = vadd.f32 %v352_v27, %v334_v31  ;;  %v335_v16 = vadd.f32 %v319_v50, %v301_v48 }
  0x94   :  { %694 = vst.msk [vmem:[#allocation7 + $0x2d] ss:$2 sm:$0x3] %vm1040_vm0, %v759_v3  ;;  %v760_v17 = vadd.f32 -1.0, %v651_v60  ;;  %v652_v38 = vmul.f32 %v1470_v30, %v401_v21 }
  0x95   :  { %v402_v2 = vadd.f32 %v386_v47, %v368_v37  ;;  %v369_v26 = vadd.f32 %v353_v29, %v335_v16 }
  0x96   :  { %696 = vst.msk [vmem:[#allocation7 + $0x31] ss:$2 sm:$0x3] %vm1040_vm0, %v760_v17  ;;  %v761_v42 = vadd.f32 -1.0, %v652_v38 }
  0x97   :  { %v653_v22 = vmul.f32 %v1490_v39, %v402_v2  ;;  %v403_v63 = vadd.f32 %v387_v13, %v369_v26 }
  0x98   :  { %698 = vst.msk [vmem:[#allocation7 + $0x35] ss:$2 sm:$0x3] %vm1040_vm0, %v761_v42 }
  0x99   :  { %v762_v51 = vadd.f32 -1.0, %v653_v22  ;;  %v654_v49 = vmul.f32 %v1520_v44, %v403_v63 }
  0x9b   :  { %700 = vst.msk [vmem:[#allocation7 + $0x39] ss:$2 sm:$0x3] %vm1040_vm0, %v762_v51  ;;  %v763_v12 = vadd.f32 -1.0, %v654_v49 }
  0x9d   :  { %702 = vst.msk [vmem:[#allocation7 + $0x3d] ss:$2 sm:$0x3] %vm1040_vm0, %v763_v12 }
  0x9e   :  { %846 = shalt.err (!%p843_p1)
}
  0x9f   :  { %s847_s20 = scalar_lea.hbm %s1652_s2, 1024 }
  0xa0   :  { %p848_p2 = scmp.ne.s32.totalorder %s1652_s2, %s847_s20  ;;  %p851_p3 = scmp.lt.u32.totalorder %s847_s20, %s1652_s2 }
  0xa2   :  { %p853_p4 = pnand %p851_p3, %p848_p2 }
  0xa4   :  { %856 = shalt.err (!%p853_p4)
}
  0xa5   :  { %s868_s25 = smov 64   ;;  %s869_s26 = smov 4  }
  0xa6   :  { %714 = dma.vmem_to_hbm [thread:$0]  %s709_s16, 1024, %s1652_s2, [#allocation4], %s868_s25, %s868_s25, %s869_s26  }
  0xa7   :  { %861 = dma.done.wait [#allocation4], 1024  }
  0xa8   :  { %862 = vsyncadd [#allocation4], 4294966272 }
  0xa9   :  { %718 = vsyncpa [#allocation3], 1 }
  0xaa   :  { %719 = vsyncpa [#allocation4], 1 }
  0xab   :  { %720 = vsyncpa [#allocation5], 1 }

</bundles_post_ra>
